<compile_context>
chip_gen: v6e
topology: v6e:2x2x1
jax: 0.10.0
libtpu: 0.0.40
codegen_flags: <defaults>
</compile_context>

<pallas_src>
import functools
import numpy as np

import jax
import jax.numpy as jnp
from jax import lax
from jax.experimental import pallas as pl
from jax.experimental.pallas import tpu as pltpu

# ----------------------------- config --------------------------------------
VOCA_SIZE = 16
IN_DIM = 32
MEM_DIM = 32
MAX_CHILDREN = 4      # children per node are padded to this many slots
SUBLANE = 8           # per-level node tile rounded up to a multiple of this


# ----------------------------- Pallas kernel -------------------------------
def _sigmoid(x):
    # sigma(x) = (1 + tanh(x/2)) / 2 : exact identity; tanh runs on the EUP
    # (free bundle slot) instead of the VALU divide of 1/(1+exp(-x)).
    return 0.5 * jnp.tanh(0.5 * x) + 0.5


def _level_kernel(emb_ref, idx_ref, w_big_ref, b_big_ref, w_fh_ref,
                  c_ref, h_ref):
    """One grid step == one tree level (B nodes, zero-padded).

    emb_ref   : (B, IN_DIM)              embeddings of this level's node slots
    idx_ref   : (B, MAX_CHILDREN) int32  child state-slot indices (sentinel->0 row)
    w_big_ref : (IN_DIM+MEM_DIM, 4*MEM_DIM)  fused [i|o|u|fx] weights (resident)
    b_big_ref : (1, 4*MEM_DIM)               fused biases (pairs pre-summed)
    w_fh_ref  : (MEM_DIM, MEM_DIM)           forget-gate child weight
    c_ref/h_ref: (NSTATE, MEM_DIM) node-state buffers, VMEM-resident across the
                 whole grid (constant output block index).
    """
    B = emb_ref.shape[0]
    NSTATE = c_ref.shape[0]
    M = w_fh_ref.shape[0]
    nk = idx_ref.shape[1]
    lvl = pl.program_id(0)

    @pl.when(lvl == 0)
    def _init():
        c_ref[...] = jnp.zeros_like(c_ref)
        h_ref[...] = jnp.zeros_like(h_ref)

    emb = emb_ref[...]
    idx = idx_ref[...]
    c_all = c_ref[...]
    h_all = h_ref[...]

    # Gather already-computed child states with one-hot matmuls on the MXU;
    # padded child slots point at a zero sentinel row -> no masking needed.
    lane_ids = lax.broadcasted_iota(jnp.int32, (B, NSTATE), 1)
    child_h, child_c = [], []
    for k in range(nk):
        onehot = jnp.where(lane_ids == idx[:, k:k + 1], 1.0, 0.0)
        child_h.append(jnp.dot(onehot, h_all, preferred_element_type=jnp.float32))
        child_c.append(jnp.dot(onehot, c_all, preferred_element_type=jnp.float32))

    h_sum = child_h[0]
    for k in range(1, nk):
        h_sum = h_sum + child_h[k]

    # Fused lane-dense gate matmul: [emb, h_sum] @ W_big -> [i | o | u | fx]
    x_cat = jnp.concatenate([emb, h_sum], axis=1)                  # (B, IN+MEM)
    gates = jnp.dot(x_cat, w_big_ref[...],
                    preferred_element_type=jnp.float32) + b_big_ref[...]
    i = _sigmoid(gates[:, 0 * M:1 * M])
    o = _sigmoid(gates[:, 1 * M:2 * M])
    u = jnp.tanh(gates[:, 2 * M:3 * M])
    fx = gates[:, 3 * M:4 * M]                                     # fx(x)+bfx+bfh

    # forget path: f_k = sigmoid(fh(child_h_k) + fx);  fc = sum_k f_k*child_c_k
    w_fh = w_fh_ref[...]
    fc = jnp.zeros((B, M), jnp.float32)
    for k in range(nk):
        f_k = _sigmoid(jnp.dot(child_h[k], w_fh,
                               preferred_element_type=jnp.float32) + fx)
        fc = fc + f_k * child_c[k]

    c_new = i * u + fc
    h_new = o * jnp.tanh(c_new)

    row = pl.multiple_of(lvl * B, B)       # B is a multiple of 8 (sublanes)
    c_ref[pl.ds(row, B), :] = c_new
    h_ref[pl.ds(row, B), :] = h_new


@functools.partial(jax.jit, static_argnames=("num_levels", "tile", "nstate"))
def forest_forward(emb_all, child_idx, w_big, b_big, w_fh, *,
                   num_levels, tile, nstate):
    """Run the whole tree/forest in a single pallas_call (grid over levels)."""
    state_shape = jax.ShapeDtypeStruct((nstate, MEM_DIM), jnp.float32)
    resident = lambda shape: pl.BlockSpec(shape, lambda l: (0, 0))
    c_all, h_all = pl.pallas_call(
        _level_kernel,
        out_shape=(state_shape, state_shape),
        grid=(num_levels,),
        in_specs=[
            pl.BlockSpec((tile, IN_DIM), lambda l: (l, 0)),        # embeddings
            pl.BlockSpec((tile, MAX_CHILDREN), lambda l: (l, 0)),  # child slots
            resident((IN_DIM + MEM_DIM, 4 * MEM_DIM)),             # W_big
            resident((1, 4 * MEM_DIM)),                            # b_big
            resident((MEM_DIM, MEM_DIM)),                          # W_fh
        ],
        out_specs=(
            pl.BlockSpec((nstate, MEM_DIM), lambda l: (0, 0)),     # c state
            pl.BlockSpec((nstate, MEM_DIM), lambda l: (0, 0)),     # h state
        ),
        # levels form a dependency chain -> sequential axis
        compiler_params=pltpu.CompilerParams(
            dimension_semantics=("arbitrary",)),
    )(emb_all, child_idx, w_big, b_big, w_fh)
    return c_all, h_all


# ----------------------------- parameters ----------------------------------
def init_params(key):
    """PyTorch Linear weights are (out, in); stored here as (in, out) so the
    kernel computes x @ W + b."""
    keys = jax.random.split(key, 10)
    s = 0.1
    emb_w = jax.random.normal(keys[0], (VOCA_SIZE, IN_DIM), jnp.float32) * s
    p = dict(
        w_ioux=jax.random.normal(keys[1], (IN_DIM, 3 * MEM_DIM), jnp.float32) * s,
        b_ioux=jax.random.normal(keys[2], (1, 3 * MEM_DIM), jnp.float32) * s,
        w_iouh=jax.random.normal(keys[3], (MEM_DIM, 3 * MEM_DIM), jnp.float32) * s,
        b_iouh=jax.random.normal(keys[4], (1, 3 * MEM_DIM), jnp.float32) * s,
        w_fx=jax.random.normal(keys[5], (IN_DIM, MEM_DIM), jnp.float32) * s,
        b_fx=jax.random.normal(keys[6], (1, MEM_DIM), jnp.float32) * s,
        w_fh=jax.random.normal(keys[7], (MEM_DIM, MEM_DIM), jnp.float32) * s,
        b_fh=jax.random.normal(keys[8], (1, MEM_DIM), jnp.float32) * s,
    )
    return emb_w, p


def pack_params(p):
    """Fuse the four Linears into one lane-dense (64, 128) weight slab, pre-sum
    the paired biases, and fold b_fh into the fx column block."""
    M = MEM_DIM
    w_x = jnp.concatenate([p["w_ioux"], p["w_fx"]], axis=1)              # (IN, 4M)
    w_h = jnp.concatenate([p["w_iouh"],
                           jnp.zeros((M, M), jnp.float32)], axis=1)      # (M, 4M)
    w_big = jnp.concatenate([w_x, w_h], axis=0)                          # (IN+M, 4M)
    b_big = jnp.concatenate([p["b_ioux"] + p["b_iouh"],
                             p["b_fx"] + p["b_fh"]], axis=1)             # (1, 4M)
    return w_big, b_big, p["w_fh"]


# ----------------------------- tree + schedule ------------------------------
class Tree:
    def __init__(self, idx, children=()):
        self.idx = idx
        self.children = list(children)
        self.num_children = len(self.children)
        self.state = None


def build_level_schedule(root):
    """Topologically-ordered level schedule (numpy, built once per tree).
    Level l occupies state rows [l*tile, (l+1)*tile); padded child pointers
    target a zero sentinel row that is never written."""
    level = {}

    def depth(t):
        level[id(t)] = 0 if not t.children else 1 + max(depth(c) for c in t.children)
        return level[id(t)]

    depth(root)
    num_levels = level[id(root)] + 1
    by_level = [[] for _ in range(num_levels)]

    def collect(t):
        for c in t.children:
            collect(c)
        by_level[level[id(t)]].append(t)

    collect(root)
    width = max(len(ns) for ns in by_level)
    tile = max(SUBLANE, ((width + SUBLANE - 1) // SUBLANE) * SUBLANE)
    sentinel = num_levels * tile                  # always-zero row
    nstate = num_levels * tile + SUBLANE          # sublane-aligned tail pad

    slot_of = {}
    for l, ns in enumerate(by_level):
        for pos, t in enumerate(ns):
            slot_of[id(t)] = l * tile + pos

    node_of_slot = np.zeros((num_levels * tile,), np.int32)
    child_idx = np.full((num_levels * tile, MAX_CHILDREN), sentinel, np.int32)
    node_slots = []
    for l, ns in enumerate(by_level):
        for pos, t in enumerate(ns):
            s = l * tile + pos
            node_of_slot[s] = t.idx
            assert t.num_children <= MAX_CHILDREN, "raise MAX_CHILDREN"
            for k, c in enumerate(t.children):
                child_idx[s, k] = slot_of[id(c)]
            node_slots.append((t, s))

    return dict(num_levels=num_levels, tile=tile, nstate=nstate,
                node_of_slot=node_of_slot, child_idx=child_idx,
                node_slots=node_slots, root_slot=slot_of[id(root)])


# ----------------------------- pure-JAX reference ----------------------------
def _node_forward_ref(emb, child_c, child_h, p):
    hp = jax.lax.Precision.HIGHEST
    dot = lambda a, b: jnp.dot(a, b, precision=hp)
    h_sum = jnp.sum(child_h, axis=0, keepdims=True)
    iou = dot(emb, p["w_ioux"]) + p["b_ioux"] + dot(h_sum, p["w_iouh"]) + p["b_iouh"]
    i, o, u = jnp.split(iou, 3, axis=1)
    i, o, u = jax.nn.sigmoid(i), jax.nn.sigmoid(o), jnp.tanh(u)
    f = jax.nn.sigmoid(dot(child_h, p["w_fh"]) + p["b_fh"]
                       + dot(emb, p["w_fx"]) + p["b_fx"])
    c = i * u + jnp.sum(f * child_c, axis=0, keepdims=True)
    h = o * jnp.tanh(c)
    return c, h


def tree_lstm_forward_ref(tree, token_ids, emb_w, params):
    for child in tree.children:
        tree_lstm_forward_ref(child, token_ids, emb_w, params)
    emb = emb_w[token_ids[tree.idx]].reshape(1, IN_DIM)
    if tree.num_children == 0:
        child_c = jnp.zeros((1, MEM_DIM), jnp.float32)
        child_h = jnp.zeros((1, MEM_DIM), jnp.float32)
    else:
        child_c = jnp.concatenate([c.state[0] for c in tree.children], axis=0)
        child_h = jnp.concatenate([c.state[1] for c in tree.children], axis=0)
    tree.state = _node_forward_ref(emb, child_c, child_h, params)
    return tree.state


# ----------------------------- main -----------------------------------------
if __name__ == "__main__":
    key = jax.random.PRNGKey(0)
    k_param, k_tok = jax.random.split(key)

    emb_w, params = init_params(k_param)
    w_big, b_big, w_fh = pack_params(params)

    # deterministic example tree (9 nodes, 3 levels, up to 4 children):
    #                 root(0)
    #            /       |       \
    #         n1(1)    n2(2)    n3(3)
    #       /  |  |  \              |
    #    n4(4) n5(5) n6(6) n7(7)  n8(8)
    n1 = Tree(1, [Tree(4), Tree(5), Tree(6), Tree(7)])
    n2 = Tree(2)
    n3 = Tree(3, [Tree(8)])
    root = Tree(0, [n1, n2, n3])
    num_nodes = 9
    token_ids = jax.random.randint(k_tok, (num_nodes,), 0, VOCA_SIZE)

    sched = build_level_schedule(root)

    # per-slot embedding gather: one plain-JAX op for the whole forest
    emb_all = emb_w[token_ids[jnp.asarray(sched["node_of_slot"])]]
    child_idx = jnp.asarray(sched["child_idx"])

    c_all, h_all = forest_forward(
        emb_all, child_idx, w_big, b_big, w_fh,
        num_levels=sched["num_levels"], tile=sched["tile"],
        nstate=sched["nstate"])
    c_all = jax.block_until_ready(c_all)
    h_all = jax.block_until_ready(h_all)

    # pure-JAX recursive reference (mirrors the PyTorch module)
    tree_lstm_forward_ref(root, token_ids, emb_w, params)
    for node, slot in sched["node_slots"]:
        c_ref, h_ref = node.state
        np.testing.assert_allclose(np.asarray(c_all[slot]), np.asarray(c_ref[0]),
                                    rtol=2e-3, atol=2e-5)
        np.testing.assert_allclose(np.asarray(h_all[slot]), np.asarray(h_ref[0]),
                                    rtol=2e-3, atol=2e-5)

    print("KERNEL_OK")
</pallas_src>

<mosaic_0001>
module attributes {stable_mosaic.version = 11 : i64} {
  func.func @_level_kernel(%arg0: i32, %arg1: memref<8x32xf32, #tpu.memory_space<vmem>>, %arg2: memref<8x4xi32, #tpu.memory_space<vmem>>, %arg3: memref<64x128xf32, #tpu.memory_space<vmem>>, %arg4: memref<1x128xf32, #tpu.memory_space<vmem>>, %arg5: memref<32x32xf32, #tpu.memory_space<vmem>>, %arg6: memref<32x32xf32, #tpu.memory_space<vmem>>, %arg7: memref<32x32xf32, #tpu.memory_space<vmem>>) attributes {dimension_semantics = [#tpu.dimension_semantics<arbitrary>], iteration_bounds = array<i64: 3>, scalar_prefetch = 0 : i64, scratch_operands = 0 : i64, tpu.core_type = #tpu.core_type<tc>, window_params = [{transform_indices = @transform_0, window_bounds = array<i64: 8, 32>}, {transform_indices = @transform_1, window_bounds = array<i64: 8, 4>}, {pipeline_mode = #tpu.pipeline_mode<synchronous>, transform_indices = @transform_2, window_bounds = array<i64: 64, 128>}, {pipeline_mode = #tpu.pipeline_mode<synchronous>, transform_indices = @transform_3, window_bounds = array<i64: 1, 128>}, {pipeline_mode = #tpu.pipeline_mode<synchronous>, transform_indices = @transform_4, window_bounds = array<i64: 32, 32>}, {pipeline_mode = #tpu.pipeline_mode<synchronous>, transform_indices = @transform_5, window_bounds = array<i64: 32, 32>}, {pipeline_mode = #tpu.pipeline_mode<synchronous>, transform_indices = @transform_6, window_bounds = array<i64: 32, 32>}]} {
    %c0_i32 = arith.constant 0 : i32
    %0 = arith.cmpi eq, %arg0, %c0_i32 : i32
    %1 = arith.extui %0 : i1 to i32
    %c0_i32_0 = arith.constant 0 : i32
    %2 = arith.cmpi ne, %1, %c0_i32_0 : i32
    scf.if %2 {
      %cst_55 = arith.constant 0.000000e+00 : f32
      %124 = vector.broadcast %cst_55 : f32 to vector<32x32xf32>
      %c0_56 = arith.constant 0 : index
      %c0_57 = arith.constant 0 : index
      %125 = vector.load %arg6[%c0_56, %c0_57] : memref<32x32xf32, #tpu.memory_space<vmem>>, vector<32x32xf32>
      tpu.vector_store %arg6[%c0_56, %c0_57], %124 {strides = array<i32>} : memref<32x32xf32, #tpu.memory_space<vmem>>, vector<32x32xf32>,
      %cst_58 = arith.constant 0.000000e+00 : f32
      %126 = vector.broadcast %cst_58 : f32 to vector<32x32xf32>
      %c0_59 = arith.constant 0 : index
      %c0_60 = arith.constant 0 : index
      %127 = vector.load %arg7[%c0_59, %c0_60] : memref<32x32xf32, #tpu.memory_space<vmem>>, vector<32x32xf32>
      tpu.vector_store %arg7[%c0_59, %c0_60], %126 {strides = array<i32>} : memref<32x32xf32, #tpu.memory_space<vmem>>, vector<32x32xf32>,
    } else {
    }
    %c0 = arith.constant 0 : index
    %c0_1 = arith.constant 0 : index
    %3 = vector.load %arg1[%c0, %c0_1] : memref<8x32xf32, #tpu.memory_space<vmem>>, vector<8x32xf32>
    %c0_2 = arith.constant 0 : index
    %c0_3 = arith.constant 0 : index
    %4 = vector.load %arg2[%c0_2, %c0_3] : memref<8x4xi32, #tpu.memory_space<vmem>>, vector<8x4xi32>
    %c0_4 = arith.constant 0 : index
    %c0_5 = arith.constant 0 : index
    %5 = vector.load %arg6[%c0_4, %c0_5] : memref<32x32xf32, #tpu.memory_space<vmem>>, vector<32x32xf32>
    %c0_6 = arith.constant 0 : index
    %c0_7 = arith.constant 0 : index
    %6 = vector.load %arg7[%c0_6, %c0_7] : memref<32x32xf32, #tpu.memory_space<vmem>>, vector<32x32xf32>
    %7 = tpu.iota {dimensions = array<i32: 1>} : vector<8x32xi32>
    %8 = vector.extract_strided_slice %4 {offsets = [0, 0], sizes = [8, 1], strides = [1, 1]} : vector<8x4xi32> to vector<8x1xi32>
    %9 = vector.broadcast %8 : vector<8x1xi32> to vector<8x32xi32>
    %10 = arith.cmpi eq, %7, %9 : vector<8x32xi32>
    %cst = arith.constant 1.000000e+00 : f32
    %cst_8 = arith.constant 0.000000e+00 : f32
    %11 = vector.broadcast %cst : f32 to vector<8x32xf32>
    %12 = vector.broadcast %cst_8 : f32 to vector<8x32xf32>
    %13 = arith.select %10, %11, %12 : vector<8x32xi1>, vector<8x32xf32>
    %cst_9 = arith.constant dense<0.000000e+00> : vector<8x32xf32>
    %14 = tpu.matmul %13, %6, %cst_9 {dimension_numbers = #tpu.dot_dimension_numbers<[1], [0], [0], [1], [0, 0, 1, 1], [], []>} : vector<8x32xf32>, vector<32x32xf32>, vector<8x32xf32> -> vector<8x32xf32>
    %cst_10 = arith.constant dense<0.000000e+00> : vector<8x32xf32>
    %15 = tpu.matmul %13, %5, %cst_10 {dimension_numbers = #tpu.dot_dimension_numbers<[1], [0], [0], [1], [0, 0, 1, 1], [], []>} : vector<8x32xf32>, vector<32x32xf32>, vector<8x32xf32> -> vector<8x32xf32>
    %16 = vector.extract_strided_slice %4 {offsets = [0, 1], sizes = [8, 1], strides = [1, 1]} : vector<8x4xi32> to vector<8x1xi32>
    %17 = vector.broadcast %16 : vector<8x1xi32> to vector<8x32xi32>
    %18 = arith.cmpi eq, %7, %17 : vector<8x32xi32>
    %cst_11 = arith.constant 1.000000e+00 : f32
    %cst_12 = arith.constant 0.000000e+00 : f32
    %19 = vector.broadcast %cst_11 : f32 to vector<8x32xf32>
    %20 = vector.broadcast %cst_12 : f32 to vector<8x32xf32>
    %21 = arith.select %18, %19, %20 : vector<8x32xi1>, vector<8x32xf32>
    %cst_13 = arith.constant dense<0.000000e+00> : vector<8x32xf32>
    %22 = tpu.matmul %21, %6, %cst_13 {dimension_numbers = #tpu.dot_dimension_numbers<[1], [0], [0], [1], [0, 0, 1, 1], [], []>} : vector<8x32xf32>, vector<32x32xf32>, vector<8x32xf32> -> vector<8x32xf32>
    %cst_14 = arith.constant dense<0.000000e+00> : vector<8x32xf32>
    %23 = tpu.matmul %21, %5, %cst_14 {dimension_numbers = #tpu.dot_dimension_numbers<[1], [0], [0], [1], [0, 0, 1, 1], [], []>} : vector<8x32xf32>, vector<32x32xf32>, vector<8x32xf32> -> vector<8x32xf32>
    %24 = vector.extract_strided_slice %4 {offsets = [0, 2], sizes = [8, 1], strides = [1, 1]} : vector<8x4xi32> to vector<8x1xi32>
    %25 = vector.broadcast %24 : vector<8x1xi32> to vector<8x32xi32>
    %26 = arith.cmpi eq, %7, %25 : vector<8x32xi32>
    %cst_15 = arith.constant 1.000000e+00 : f32
    %cst_16 = arith.constant 0.000000e+00 : f32
    %27 = vector.broadcast %cst_15 : f32 to vector<8x32xf32>
    %28 = vector.broadcast %cst_16 : f32 to vector<8x32xf32>
    %29 = arith.select %26, %27, %28 : vector<8x32xi1>, vector<8x32xf32>
    %cst_17 = arith.constant dense<0.000000e+00> : vector<8x32xf32>
    %30 = tpu.matmul %29, %6, %cst_17 {dimension_numbers = #tpu.dot_dimension_numbers<[1], [0], [0], [1], [0, 0, 1, 1], [], []>} : vector<8x32xf32>, vector<32x32xf32>, vector<8x32xf32> -> vector<8x32xf32>
    %cst_18 = arith.constant dense<0.000000e+00> : vector<8x32xf32>
    %31 = tpu.matmul %29, %5, %cst_18 {dimension_numbers = #tpu.dot_dimension_numbers<[1], [0], [0], [1], [0, 0, 1, 1], [], []>} : vector<8x32xf32>, vector<32x32xf32>, vector<8x32xf32> -> vector<8x32xf32>
    %32 = vector.extract_strided_slice %4 {offsets = [0, 3], sizes = [8, 1], strides = [1, 1]} : vector<8x4xi32> to vector<8x1xi32>
    %33 = vector.broadcast %32 : vector<8x1xi32> to vector<8x32xi32>
    %34 = arith.cmpi eq, %7, %33 : vector<8x32xi32>
    %cst_19 = arith.constant 1.000000e+00 : f32
    %cst_20 = arith.constant 0.000000e+00 : f32
    %35 = vector.broadcast %cst_19 : f32 to vector<8x32xf32>
    %36 = vector.broadcast %cst_20 : f32 to vector<8x32xf32>
    %37 = arith.select %34, %35, %36 : vector<8x32xi1>, vector<8x32xf32>
    %cst_21 = arith.constant dense<0.000000e+00> : vector<8x32xf32>
    %38 = tpu.matmul %37, %6, %cst_21 {dimension_numbers = #tpu.dot_dimension_numbers<[1], [0], [0], [1], [0, 0, 1, 1], [], []>} : vector<8x32xf32>, vector<32x32xf32>, vector<8x32xf32> -> vector<8x32xf32>
    %cst_22 = arith.constant dense<0.000000e+00> : vector<8x32xf32>
    %39 = tpu.matmul %37, %5, %cst_22 {dimension_numbers = #tpu.dot_dimension_numbers<[1], [0], [0], [1], [0, 0, 1, 1], [], []>} : vector<8x32xf32>, vector<32x32xf32>, vector<8x32xf32> -> vector<8x32xf32>
    %40 = arith.addf %14, %22 : vector<8x32xf32>
    %41 = arith.addf %40, %30 : vector<8x32xf32>
    %42 = arith.addf %41, %38 : vector<8x32xf32>
    %43 = tpu.concatenate %3, %42 in 1 : vector<8x32xf32>, vector<8x32xf32> -> vector<8x64xf32>
    %c0_23 = arith.constant 0 : index
    %c0_24 = arith.constant 0 : index
    %44 = vector.load %arg3[%c0_23, %c0_24] : memref<64x128xf32, #tpu.memory_space<vmem>>, vector<64x128xf32>
    %cst_25 = arith.constant dense<0.000000e+00> : vector<8x128xf32>
    %45 = tpu.matmul %43, %44, %cst_25 {dimension_numbers = #tpu.dot_dimension_numbers<[1], [0], [0], [1], [0, 0, 1, 1], [], []>} : vector<8x64xf32>, vector<64x128xf32>, vector<8x128xf32> -> vector<8x128xf32>
    %c0_26 = arith.constant 0 : index
    %c0_27 = arith.constant 0 : index
    %46 = vector.load %arg4[%c0_26, %c0_27] : memref<1x128xf32, #tpu.memory_space<vmem>>, vector<1x128xf32>
    %47 = vector.broadcast %46 : vector<1x128xf32> to vector<8x128xf32>
    %48 = arith.addf %45, %47 : vector<8x128xf32>
    %49 = vector.extract_strided_slice %48 {offsets = [0, 0], sizes = [8, 32], strides = [1, 1]} : vector<8x128xf32> to vector<8x32xf32>
    %cst_28 = arith.constant 5.000000e-01 : f32
    %50 = vector.broadcast %cst_28 : f32 to vector<8x32xf32>
    %51 = arith.mulf %50, %49 : vector<8x32xf32>
    %52 = math.tanh %51 : vector<8x32xf32>
    %cst_29 = arith.constant 5.000000e-01 : f32
    %53 = vector.broadcast %cst_29 : f32 to vector<8x32xf32>
    %54 = arith.mulf %53, %52 : vector<8x32xf32>
    %cst_30 = arith.constant 5.000000e-01 : f32
    %55 = vector.broadcast %cst_30 : f32 to vector<8x32xf32>
    %56 = arith.addf %54, %55 : vector<8x32xf32>
    %57 = vector.extract_strided_slice %48 {offsets = [0, 32], sizes = [8, 32], strides = [1, 1]} : vector<8x128xf32> to vector<8x32xf32>
    %cst_31 = arith.constant 5.000000e-01 : f32
    %58 = vector.broadcast %cst_31 : f32 to vector<8x32xf32>
    %59 = arith.mulf %58, %57 : vector<8x32xf32>
    %60 = math.tanh %59 : vector<8x32xf32>
    %cst_32 = arith.constant 5.000000e-01 : f32
    %61 = vector.broadcast %cst_32 : f32 to vector<8x32xf32>
    %62 = arith.mulf %61, %60 : vector<8x32xf32>
    %cst_33 = arith.constant 5.000000e-01 : f32
    %63 = vector.broadcast %cst_33 : f32 to vector<8x32xf32>
    %64 = arith.addf %62, %63 : vector<8x32xf32>
    %65 = vector.extract_strided_slice %48 {offsets = [0, 64], sizes = [8, 32], strides = [1, 1]} : vector<8x128xf32> to vector<8x32xf32>
    %66 = math.tanh %65 : vector<8x32xf32>
    %67 = vector.extract_strided_slice %48 {offsets = [0, 96], sizes = [8, 32], strides = [1, 1]} : vector<8x128xf32> to vector<8x32xf32>
    %c0_34 = arith.constant 0 : index
    %c0_35 = arith.constant 0 : index
    %68 = vector.load %arg5[%c0_34, %c0_35] : memref<32x32xf32, #tpu.memory_space<vmem>>, vector<32x32xf32>
    %cst_36 = arith.constant 0.000000e+00 : f32
    %69 = vector.broadcast %cst_36 : f32 to vector<8x32xf32>
    %cst_37 = arith.constant dense<0.000000e+00> : vector<8x32xf32>
    %70 = tpu.matmul %14, %68, %cst_37 {dimension_numbers = #tpu.dot_dimension_numbers<[1], [0], [0], [1], [0, 0, 1, 1], [], []>} : vector<8x32xf32>, vector<32x32xf32>, vector<8x32xf32> -> vector<8x32xf32>
    %71 = arith.addf %70, %67 : vector<8x32xf32>
    %cst_38 = arith.constant 5.000000e-01 : f32
    %72 = vector.broadcast %cst_38 : f32 to vector<8x32xf32>
    %73 = arith.mulf %72, %71 : vector<8x32xf32>
    %74 = math.tanh %73 : vector<8x32xf32>
    %cst_39 = arith.constant 5.000000e-01 : f32
    %75 = vector.broadcast %cst_39 : f32 to vector<8x32xf32>
    %76 = arith.mulf %75, %74 : vector<8x32xf32>
    %cst_40 = arith.constant 5.000000e-01 : f32
    %77 = vector.broadcast %cst_40 : f32 to vector<8x32xf32>
    %78 = arith.addf %76, %77 : vector<8x32xf32>
    %79 = arith.mulf %78, %15 : vector<8x32xf32>
    %80 = arith.addf %69, %79 : vector<8x32xf32>
    %cst_41 = arith.constant dense<0.000000e+00> : vector<8x32xf32>
    %81 = tpu.matmul %22, %68, %cst_41 {dimension_numbers = #tpu.dot_dimension_numbers<[1], [0], [0], [1], [0, 0, 1, 1], [], []>} : vector<8x32xf32>, vector<32x32xf32>, vector<8x32xf32> -> vector<8x32xf32>
    %82 = arith.addf %81, %67 : vector<8x32xf32>
    %cst_42 = arith.constant 5.000000e-01 : f32
    %83 = vector.broadcast %cst_42 : f32 to vector<8x32xf32>
    %84 = arith.mulf %83, %82 : vector<8x32xf32>
    %85 = math.tanh %84 : vector<8x32xf32>
    %cst_43 = arith.constant 5.000000e-01 : f32
    %86 = vector.broadcast %cst_43 : f32 to vector<8x32xf32>
    %87 = arith.mulf %86, %85 : vector<8x32xf32>
    %cst_44 = arith.constant 5.000000e-01 : f32
    %88 = vector.broadcast %cst_44 : f32 to vector<8x32xf32>
    %89 = arith.addf %87, %88 : vector<8x32xf32>
    %90 = arith.mulf %89, %23 : vector<8x32xf32>
    %91 = arith.addf %80, %90 : vector<8x32xf32>
    %cst_45 = arith.constant dense<0.000000e+00> : vector<8x32xf32>
    %92 = tpu.matmul %30, %68, %cst_45 {dimension_numbers = #tpu.dot_dimension_numbers<[1], [0], [0], [1], [0, 0, 1, 1], [], []>} : vector<8x32xf32>, vector<32x32xf32>, vector<8x32xf32> -> vector<8x32xf32>
    %93 = arith.addf %92, %67 : vector<8x32xf32>
    %cst_46 = arith.constant 5.000000e-01 : f32
    %94 = vector.broadcast %cst_46 : f32 to vector<8x32xf32>
    %95 = arith.mulf %94, %93 : vector<8x32xf32>
    %96 = math.tanh %95 : vector<8x32xf32>
    %cst_47 = arith.constant 5.000000e-01 : f32
    %97 = vector.broadcast %cst_47 : f32 to vector<8x32xf32>
    %98 = arith.mulf %97, %96 : vector<8x32xf32>
    %cst_48 = arith.constant 5.000000e-01 : f32
    %99 = vector.broadcast %cst_48 : f32 to vector<8x32xf32>
    %100 = arith.addf %98, %99 : vector<8x32xf32>
    %101 = arith.mulf %100, %31 : vector<8x32xf32>
    %102 = arith.addf %91, %101 : vector<8x32xf32>
    %cst_49 = arith.constant dense<0.000000e+00> : vector<8x32xf32>
    %103 = tpu.matmul %38, %68, %cst_49 {dimension_numbers = #tpu.dot_dimension_numbers<[1], [0], [0], [1], [0, 0, 1, 1], [], []>} : vector<8x32xf32>, vector<32x32xf32>, vector<8x32xf32> -> vector<8x32xf32>
    %104 = arith.addf %103, %67 : vector<8x32xf32>
    %cst_50 = arith.constant 5.000000e-01 : f32
    %105 = vector.broadcast %cst_50 : f32 to vector<8x32xf32>
    %106 = arith.mulf %105, %104 : vector<8x32xf32>
    %107 = math.tanh %106 : vector<8x32xf32>
    %cst_51 = arith.constant 5.000000e-01 : f32
    %108 = vector.broadcast %cst_51 : f32 to vector<8x32xf32>
    %109 = arith.mulf %108, %107 : vector<8x32xf32>
    %cst_52 = arith.constant 5.000000e-01 : f32
    %110 = vector.broadcast %cst_52 : f32 to vector<8x32xf32>
    %111 = arith.addf %109, %110 : vector<8x32xf32>
    %112 = arith.mulf %111, %39 : vector<8x32xf32>
    %113 = arith.addf %102, %112 : vector<8x32xf32>
    %114 = arith.mulf %56, %66 : vector<8x32xf32>
    %115 = arith.addf %114, %113 : vector<8x32xf32>
    %116 = math.tanh %115 : vector<8x32xf32>
    %117 = arith.mulf %64, %116 : vector<8x32xf32>
    %c8_i32 = arith.constant 8 : i32
    %118 = arith.muli %arg0, %c8_i32 : i32
    %119 = tpu.assume_multiple %118, 8 : i32
    %120 = arith.index_cast %119 : i32 to index
    %c0_53 = arith.constant 0 : index
    %121 = vector.load %arg6[%120, %c0_53] : memref<32x32xf32, #tpu.memory_space<vmem>>, vector<8x32xf32>
    tpu.vector_store %arg6[%120, %c0_53], %115 {strides = array<i32>} : memref<32x32xf32, #tpu.memory_space<vmem>>, vector<8x32xf32>,
    %122 = arith.index_cast %119 : i32 to index
    %c0_54 = arith.constant 0 : index
    %123 = vector.load %arg7[%122, %c0_54] : memref<32x32xf32, #tpu.memory_space<vmem>>, vector<8x32xf32>
    tpu.vector_store %arg7[%122, %c0_54], %117 {strides = array<i32>} : memref<32x32xf32, #tpu.memory_space<vmem>>, vector<8x32xf32>,
    return
  }
  func.func @transform_0(%arg0: i32) -> (i32, i32) {
    %c0_i32 = arith.constant 0 : i32
    %c0_i32_0 = arith.constant 0 : i32
    return %arg0, %c0_i32 : i32, i32
  }
  func.func @transform_1(%arg0: i32) -> (i32, i32) {
    %c0_i32 = arith.constant 0 : i32
    %c0_i32_0 = arith.constant 0 : i32
    return %arg0, %c0_i32 : i32, i32
  }
  func.func @transform_2(%arg0: i32) -> (i32, i32) {
    %c0_i32 = arith.constant 0 : i32
    %c0_i32_0 = arith.constant 0 : i32
    %c0_i32_1 = arith.constant 0 : i32
    return %c0_i32, %c0_i32_0 : i32, i32
  }
  func.func @transform_3(%arg0: i32) -> (i32, i32) {
    %c0_i32 = arith.constant 0 : i32
    %c0_i32_0 = arith.constant 0 : i32
    %c0_i32_1 = arith.constant 0 : i32
    return %c0_i32, %c0_i32_0 : i32, i32
  }
  func.func @transform_4(%arg0: i32) -> (i32, i32) {
    %c0_i32 = arith.constant 0 : i32
    %c0_i32_0 = arith.constant 0 : i32
    %c0_i32_1 = arith.constant 0 : i32
    return %c0_i32, %c0_i32_0 : i32, i32
  }
  func.func @transform_5(%arg0: i32) -> (i32, i32) {
    %c0_i32 = arith.constant 0 : i32
    %c0_i32_0 = arith.constant 0 : i32
    %c0_i32_1 = arith.constant 0 : i32
    return %c0_i32, %c0_i32_0 : i32, i32
  }
  func.func @transform_6(%arg0: i32) -> (i32, i32) {
    %c0_i32 = arith.constant 0 : i32
    %c0_i32_0 = arith.constant 0 : i32
    %c0_i32_1 = arith.constant 0 : i32
    return %c0_i32, %c0_i32_0 : i32, i32
  }
}

</mosaic_0001>

<bundles_post_ra>
// kernel: forest_forward.1
= control target key start
LH: loop header
LB: loop body
LE: loop exit
PB: predicated region body
PF: predicated region fallthrough
CT: control target
= control target key end

     0   :  { %12 = vsyncpa [#allocation3], 0  ;;  %s2374_s0 = inlined_call_operand.hbm [shape: f32[24,32], index: 0, kind: input, shape index: {}]   ;;  %s2375_s1 = inlined_call_operand.vmem [shape: s32[24,4], index: 1, kind: input, shape index: {}]   ;;  %s2376_s2 = inlined_call_operand.hbm [shape: f32[64,128], index: 2, kind: input, shape index: {}]   ;;  %s2377_s3 = inlined_call_operand.vmem [shape: f32[1,128], index: 3, kind: input, shape index: {}]   ;;  %s2378_s4 = inlined_call_operand.vmem [shape: f32[32,32], index: 4, kind: input, shape index: {}]   ;;  %s2379_s5 = inlined_call_operand.hbm [shape: f32[32,32], index: 5, kind: output, shape index: {0}]   ;;  %s2380_s6 = inlined_call_operand.hbm [shape: f32[32,32], index: 6, kind: output, shape index: {1}]  }
   0x1   :  { %14 = vsyncpa [#allocation3 + $0x1], 0 }
   0x2   :  { %15 = vsyncpa [#allocation6], 0 }
   0x3   :  { %16 = vsyncpa [#allocation4], 0 }
   0x4   :  { %17 = vsyncpa [#allocation9], 0  ;;  %s2012_s21 = smov 0   ;;  %s2014_s22 = smov 0  }
   0x5   :  { %s2016_s23 = smov 0   ;;  %s2018_s24 = smov 0  }
   0x6 LB: > { %s2031_s25 = sadd.s32 4294967295, %s1957_s24   ;;  %p43_p0 = scmp.ne.s32.totalorder %s1949_s22, %s1945_s21  ;;  %s1957_s24 = sphi %s2018_s24, %s2396_s24   ;;  %s1953_s23 = sphi %s2016_s23, %s2395_s23   ;;  %s1949_s22 = sphi %s2014_s22, %s2394_s22   ;;  %s1945_s21 = sphi %s2012_s21, %s2393_s21  }
   0x7   : > { %p2381_p1 = scmp.eq.s32.totalorder %s2031_s25, 0  ;;  %p1461_p2 = scmp.ge.s32.totalorder %s1957_s24, 1 }
   0x8   : > { %p185_p3 = scmp.lt.s32.totalorder %s1957_s24, 4  ;;  %s1959_s28 = smov [#allocation5]  }
   0x9   : > { %p2040_p5 = por %p2381_p1, %p43_p0  ;;  %s197_s29 = sshll.u32 %s1959_s28, 4  ;;  %s198_s29 = int_to_ptr.vmem [resolvable:$true] %s197_s29 }
   0xa   : > { %p2044_p6 = pnand %p1461_p2, %p185_p3  ;;  %s2057_s7 = sadd.s32 1, %s1957_s24  }
   0xb   : > { %s2384_s26 = scalar_select %p2040_p5, 1, 0 }
   0xc   : > { %s2385_s27 = scalar_select %p2044_p6, 1, 0 }
   0xd   : > { %p1726_p7 = pneg %p2044_p6  ;;  %s30_s8 = sadd.s32 1, %s1953_s23 }
   0xe   : > { %s27_s9 = ssub.s32 %s1957_s24, %s2057_s7  ;;  %s1820_s10 = scalar_lea.vmem %s198_s29, 1024 }
   0xf   : > { %p2052_p8 = pnand %p1726_p7, %p2381_p1  ;;  %p1821_p10 = scmp.ne.s32.totalorder %s198_s29, %s1820_s10 }
  0x10   : > { %p1828_p13 = scmp.lt.s32.totalorder %s198_s29, %s198_s29  ;;  %p1829_p0 = scmp.lt.s32.totalorder %s1820_s10, %s1820_s10 }
  0x11   : > { %p1811_p9 = pneg %p2052_p8 }
  0x12   : > { %p1830_p2 = por %p1829_p0, %p1828_p13 }
  0x13   : > { %p1823_p11 = pnand %p1821_p10, %p1811_p9 }
  0x15   : > { %p1824_p12 = pneg %p1823_p11 }
  0x17   : > { %p1831_p3 = pnand %p1830_p2, %p1824_p12 }
  0x19   : > { %1834 = shalt.err (!%p1831_p3)
}
  0x1a   : > { %s1960_s11 = smov 128   ;;  %s1961_s12 = smov 8  }
  0x1b   : > { %1729 = dma.hbm_to_vmem [thread:$0]  (!%p2052_p8), %s2376_s2, 1024, %s198_s29, [#allocation6], %s1960_s11, %s1960_s11, %s1961_s12  }
  0x1c   : > { %p28_p7 = scmp.eq.s32.totalorder %s27_s9, 0  ;;  %p37_p9 = scmp.ne.s32.totalorder %s1953_s23, %s1949_s22 }
  0x1d   : > { %p38_p10 = scmp.eq.s32.totalorder %s1957_s24, 0  ;;  %p1735_p11 = scmp.lt.s32.totalorder %s1957_s24, 3 }
  0x1e   : > { %s2074_s15 = scalar_select %p28_p7, %s1953_s23, %s30_s8  }
  0x1f   : > { %p39_p12 = por %p38_p10, %p37_p9  ;;  %s217_s16 = sand.u32 1, %s1953_s23  }
  0x20   : > { %s1464_s17 = sshll.u32 %s217_s16, 3  ;;  %s1465_s18 = sshll.u32 %s1957_s24, 7 }
  0x21   : > { %s2081_s21 = scalar_lea.hbm %s2374_s0, %s1465_s18  ;;  %s221_s28 = scalar_lea.vmem [#allocation2], %s1464_s17 }
  0x22   : > { %s228_s29 = sshll.u32 %s221_s28, 4  ;;  %p2083_p8 = pnand %p1735_p11, %p39_p12  ;;  %s229_s29 = int_to_ptr.vmem [resolvable:$true] %s228_s29 }
  0x23   : > { %s218_s8 = scalar_lea.sflag [#allocation3], %s217_s16  ;;  %s1835_s9 = scalar_lea.hbm %s2081_s21, 128 }
  0x24   : > { %p1836_p13 = scmp.ne.s32.totalorder %s2081_s21, %s1835_s9  ;;  %p1837_p0 = pneg %p2083_p8 }
  0x25   : > { %s1840_s11 = scalar_lea.hbm %s2374_s0, 384  ;;  %p1841_p7 = scmp.lt.s32.totalorder %s2081_s21, %s2374_s0 }
  0x26   : > { %p1838_p2 = pnand %p1837_p0, %p1836_p13  ;;  %p1842_p9 = scmp.lt.s32.totalorder %s1840_s11, %s1835_s9 }
  0x28   : > { %p1839_p3 = pneg %p1838_p2  ;;  %p1843_p10 = por %p1842_p9, %p1841_p7 }
  0x2a   : > { %p1844_p11 = pnand %p1843_p10, %p1839_p3 }
  0x2c   : > { %1847 = shalt.err (!%p1844_p11)
}
  0x2d   : > { %s1848_s14 = scalar_lea.vmem %s229_s29, 128  ;;  %s1962_s16 = smov [#allocation2]  }
  0x2e   : > { %p1849_p12 = scmp.ne.s32.totalorder %s229_s29, %s1848_s14  ;;  %s1853_s17 = sshll.u32 %s1962_s16, 4  ;;  %s1854_s17 = int_to_ptr.vmem [resolvable:$false] %s1853_s17 }
  0x2f   : > { %s1855_s18 = scalar_lea.vmem %s1854_s17, 256  ;;  %p1856_p13 = scmp.lt.s32.totalorder %s229_s29, %s1854_s17 }
  0x30   : > { %p1851_p4 = pnand %p1849_p12, %p1837_p0  ;;  %p1857_p2 = scmp.lt.s32.totalorder %s1855_s18, %s1848_s14 }
  0x32   : > { %p1852_p1 = pneg %p1851_p4  ;;  %p1858_p5 = por %p1857_p2, %p1856_p13 }
  0x34   : > { %p1859_p6 = pnand %p1858_p5, %p1852_p1 }
  0x36   : > { %1862 = shalt.err (!%p1859_p6)
}
  0x37   : > { %1733 = dma.hbm_to_vmem [thread:$0]  (!%p2083_p8), %s2081_s21, 128, %s229_s29, %s218_s8  }
  0x38   : > { %p2388_p3 = scmp.ne.s32.totalorder %s2385_s27, 0 }
  0x39   : > { %s246_s19 = sand.u32 (!%p2388_p3), 1, %s1949_s22   ;;  %p2389_p4 = scmp.ne.s32.totalorder (!%p2388_p3), %s2384_s26, 0 }
  0x3a   : > { %244 = sbr.rel (%p2388_p3) target bundleno = 1144 (0x478), region = 40  ;;  %s2104_s20 = sshll.u32 (!%p2388_p3), %s246_s19, 3 }
  0x3b   : > { %s247_s28 = scalar_lea.sflag (!%p2388_p3), [#allocation3], %s246_s19  ;;  %s250_s9 = scalar_lea.vmem (!%p2388_p3), [#allocation2], %s2104_s20 }
  0x3f   : > { %1928 = dma.done.wait (%p2389_p4), %s247_s28, 128  }
  0x40   : > { %1930 = vsyncadd (%p2389_p4), %s247_s28, 4294967168  ;;  %p2390_p1 = scmp.eq.s32.totalorder %s2031_s25, 0 }
  0x42   : > { %1932 = dma.done.wait (%p2390_p1), [#allocation6], 1024   ;;  %p2391_p5 = pmov %p2390_p1 }
  0x43   : > { %p282_p6 = scmp.lt.s32.totalorder %s2031_s25, 2  ;;  %p2392_p8 = scmp.ne.s32.totalorder %s2031_s25, 0 }
  0x44   : > { %1934 = vsyncadd (%p2391_p5), [#allocation6], 4294966272 }
  0x45   : > { %s283_s27 = scalar_select %p282_p6, %s2031_s25, 2 }
  0x46   : > { %289 = sbr.rel (%p2392_p8) target bundleno = 80 (0x50), region = 52 }
  0x47   : > { %s1469_s21 = sshll.u32 %s283_s27, 3 }
  0x48   : > { %s285_s8 = scalar_lea.vmem %s2375_s1, %s1469_s21 }
  0x4b   : > { %vm290_vm0 = vcmask 261120   ;;  %v1963_v0 = vmov 0.0  }
  0x4c   : > { %291 = vst.msk [vmem:[#allocation7] sm:$0xff] %vm290_vm0, %v1963_v0  ;;  %292 = vst.msk [vmem:[#allocation7 + $0x8] sm:$0xff] %vm290_vm0, %v1963_v0 }
  0x4d   : > { %293 = vst.msk [vmem:[#allocation7 + $0x10] sm:$0xff] %vm290_vm0, %v1963_v0  ;;  %294 = vst.msk [vmem:[#allocation7 + $0x18] sm:$0xff] %vm290_vm0, %v1963_v0 }
  0x4e   : > { %295 = vst.msk [vmem:[#allocation8] sm:$0xff] %vm290_vm0, %v1963_v0  ;;  %296 = vst.msk [vmem:[#allocation8 + $0x8] sm:$0xff] %vm290_vm0, %v1963_v0 }
  0x4f   : > { %297 = vst.msk [vmem:[#allocation8 + $0x10] sm:$0xff] %vm290_vm0, %v1963_v0  ;;  %298 = vst.msk [vmem:[#allocation8 + $0x18] sm:$0xff] %vm290_vm0, %v1963_v0 }
  0x50 PF: > { %v300_v1 = vld [vmem:[%s285_s8] sm:$0xff]  ;;  %v1964_v2 = vmov 0   ;;  %v1965_v3 = vmov 2   ;;  %v1966_v6 = vmov 0.0   ;;  %v1967_v9 = vmov 1   ;;  %v2237_v25 = vld [vmem:[%s2378_s4 + $0x18] sm:$0xff] }
  0x51   : > { %1790 = vset.pattern.permute.xlu0 %v1964_v2  ;;  %1792 = vset.pattern.permute.xlu1 %v1965_v3  ;;  %v1968_v10 = vmov 3   ;;  %vm1969_vm1 = vmmov 0   ;;  %v309_v15 = vlaneseq  ;;  %vm316_vm2 = vcmask 261120   ;;  %v2245_v26 = vld [vmem:[%s2378_s4 + $0x10] sm:$0xff]  ;;  %v2255_v27 = vld [vmem:[%s2378_s4 + $0x8] sm:$0xff]  ;;  %v2264_v28 = vld [vmem:[%s2378_s4] sm:$0xff] }
  0x52   : > { %312 = vperm.xlu0 %1790, %v300_v1   ;;  %609 = vperm.xlu1 %1792, %v300_v1   ;;  %v919_v29 = vld [vmem:[#allocation5 + $0x38] sm:$0xff]  ;;  %v918_v30 = vld [vmem:[#allocation5 + $0x30] sm:$0xff]  ;;  %v917_v31 = vld [vmem:[#allocation5 + $0x28] sm:$0xff]  ;;  %s1970_s17 = smov 32   ;;  %vm927_vm7 = vcmask 523264   ;;  %s1971_s20 = smov 64  }
  0x53   : > { %1561 = vmatprep.subr.mxu0 %v1966_v6  ;;  %1572 = vmatprep.subr.mxu1 %v1966_v6  ;;  %v2138_v12 = vld [vmem:[#allocation7 + $0x8] sm:$0xff]  ;;  %v2146_v14 = vld [vmem:[#allocation7] sm:$0xff]  ;;  %v2160_v16 = vand.u32 127, %v309_v15  ;;  %v915_v33 = vld [vmem:[#allocation5 + $0x18] sm:$0xff]  ;;  %s1485_s28 = sshll.u32 %s2031_s25, 3  ;;  %p1737_p0 = scmp.eq.s32.totalorder %s2031_s25, 2 }
  0x54   : > { %v2124_v5 = vld [vmem:[#allocation7 + $0x18] sm:$0xff]  ;;  %v2134_v8 = vld [vmem:[#allocation7 + $0x10] sm:$0xff]  ;;  %1569 = vmatprep.mubr.msk.f32.mxu0 %vm1969_vm1, %v1966_v6  ;;  %1580 = vmatprep.mubr.msk.f32.mxu1 %vm1969_vm1, %v1966_v6  ;;  %v916_v32 = vld [vmem:[#allocation5 + $0x20] sm:$0xff]  ;;  %s1972_s27 = smov [#allocation7]  }
  0x55   : > { %1573 = vmatpush3.msra.mxu1 %v2124_v5  ;;  %v2136_v11 = vld [vmem:[#allocation8 + $0x8] sm:$0xff]  ;;  %v2144_v13 = vld [vmem:[#allocation8] sm:$0xff]  ;;  %v914_v34 = vld [vmem:[#allocation5 + $0x10] sm:$0xff]  ;;  %s1357_s21 = sshll.u32 %s1972_s27, 4  ;;  %s1358_s21 = int_to_ptr.vmem [resolvable:$true] %s1357_s21 }
  0x56   : > { %v2122_v4 = vld [vmem:[#allocation8 + $0x18] sm:$0xff]  ;;  %1574 = vmatprep.subr.mxu1 %v1966_v6  ;;  %v2132_v7 = vld [vmem:[#allocation8 + $0x10] sm:$0xff]  ;;  %1791 = vset.pattern.permute.xlu0 %v1967_v9  ;;  %v913_v35 = vld [vmem:[#allocation5 + $0x8] sm:$0xff]  ;;  %s1863_s29 = scalar_lea.vmem %s1358_s21, 512  ;;  %p1870_p11 = scmp.lt.s32.totalorder %s1358_s21, %s1358_s21 }
  0x57   : > { %1562 = vmatpush3.msra.mxu0 %v2122_v4  ;;  %1793 = vset.pattern.permute.xlu1 %v1968_v10  ;;  %v912_v36 = vld [vmem:[#allocation5] sm:$0xff]  ;;  %v299_v56 = vld [vmem:[%s250_s9] sm:$0xff]  ;;  %s1343_s9 = scalar_lea.vmem [#allocation7], %s1485_s28  ;;  %p1864_p7 = scmp.ne.s32.totalorder %s1358_s21, %s1863_s29 }
  0x58   : > { %1563 = vmatprep.subr.mxu0 %v1966_v6  ;;  %461 = vperm.xlu0 %1791, %v300_v1   ;;  %p1871_p12 = scmp.lt.s32.totalorder %s1863_s29, %s1863_s29 }
  0x59   : > { %757 = vperm.xlu1 %1793, %v300_v1   ;;  %1564 = vmatpush3.msra.mxu0 %v2132_v7  ;;  %v1479_v1 = vld [vmem:[%s2377_s3] ss:$0 sm:$0xff]  ;;  %p1865_p9 = pnand %p1864_p7, %p1737_p0 }
  0x5a   : > { %1575 = vmatpush3.msra.mxu1 %v2134_v8  ;;  %1565 = vmatprep.subr.mxu0 %v1966_v6  ;;  %p1872_p13 = por %p1871_p12, %p1870_p11 }
  0x5b   : > { %1576 = vmatprep.subr.mxu1 %v1966_v6  ;;  %1566 = vmatpush3.msra.mxu0 %v2136_v11  ;;  %p1866_p10 = pneg %p1865_p9 }
  0x5c   : > { %1577 = vmatpush3.msra.mxu1 %v2138_v12  ;;  %1567 = vmatprep.subr.mxu0 %v1966_v6 }
  0x5d   : > { %1578 = vmatprep.subr.mxu1 %v1966_v6  ;;  %1568 = vmatpush3.msra.mxu0 %v2144_v13  ;;  %p1873_p2 = pnand %p1872_p13, %p1866_p10 }
  0x5e   : > { %1579 = vmatpush3.msra.mxu1 %v2146_v14  ;;  %1583 = vmatprep.subr.mxu0 %v1966_v6 }
  0x5f   : > { %1594 = vmatprep.subr.mxu1 %v1966_v6  ;;  %1794 = vset.pattern.permute.xlu0 %v1968_v10 }
  0xcd   : > { %v313_v17 = vpop.permute.xlu0 %312  ;;  %v610_v21 = vpop.permute.xlu1 %609 }
  0xce   : > { %vm314_vm3 = vcmp.eq.s32.totalorder %v2160_v16, %v313_v17  ;;  %vm611_vm5 = vcmp.eq.s32.totalorder %v2160_v16, %v610_v21 }
  0xcf   : > { %v315_v18 = vsel %vm314_vm3, 1.0, %v1966_v6  ;;  %v612_v22 = vsel %vm611_vm5, 1.0, %v1966_v6 }
  0xd0   : > { %1570 = vmatmul.mubr.msk.f32.vlgmr.msra.gmra.mxu0 %vm316_vm2, %v315_v18  ;;  %1581 = vmatmul.mubr.msk.f32.vlgmr.msra.gmra.mxu1 %vm316_vm2, %v315_v18 }
  0xd1   : > { %1584 = vmatpush3.msra.mxu0 %v2122_v4  ;;  %1595 = vmatpush3.msra.mxu1 %v2124_v5 }
  0xd2   : > { %1585 = vmatprep.subr.mxu0 %v1966_v6  ;;  %1596 = vmatprep.subr.mxu1 %v1966_v6 }
  0xd3   : > { %v462_v19 = vpop.permute.xlu0 %461  ;;  %1586 = vmatpush3.msra.mxu0 %v2132_v7  ;;  %1597 = vmatpush3.msra.mxu1 %v2134_v8 }
  0xd4   : > { %vm463_vm4 = vcmp.eq.s32.totalorder %v2160_v16, %v462_v19  ;;  %1587 = vmatprep.subr.mxu0 %v1966_v6  ;;  %1598 = vmatprep.subr.mxu1 %v1966_v6  ;;  %v758_v23 = vpop.permute.xlu1 %757 }
  0xd5   : > { %1588 = vmatpush3.msra.mxu0 %v2136_v11  ;;  %1599 = vmatpush3.msra.mxu1 %v2138_v12  ;;  %v464_v20 = vsel %vm463_vm4, 1.0, %v1966_v6  ;;  %vm759_vm6 = vcmp.eq.s32.totalorder %v2160_v16, %v758_v23 }
  0xd6   : > { %1589 = vmatprep.subr.mxu0 %v1966_v6  ;;  %1600 = vmatprep.subr.mxu1 %v1966_v6  ;;  %v760_v24 = vsel %vm759_vm6, 1.0, %v1966_v6 }
  0xd7   : > { %1590 = vmatpush3.msra.mxu0 %v2144_v13  ;;  %1591 = vmatprep.mubr.msk.f32.mxu0 %vm1969_vm1, %v1966_v6 }
  0xd8   : > { %1601 = vmatpush3.msra.mxu1 %v2146_v14  ;;  %1602 = vmatprep.mubr.msk.f32.mxu1 %vm1969_vm1, %v1966_v6 }
  0xd9   : > { %1592 = vmatmul.mubr.msk.f32.vlgmr.msra.gmra.mxu0 %vm316_vm2, %v464_v20  ;;  %1603 = vmatmul.mubr.msk.f32.vlgmr.msra.gmra.mxu1 %vm316_vm2, %v464_v20 }
  0xda   : > { %1605 = vmatprep.subr.mxu0 %v1966_v6  ;;  %1616 = vmatprep.subr.mxu1 %v1966_v6 }
  0xdb   : > { %1606 = vmatpush3.msra.mxu0 %v2122_v4  ;;  %1617 = vmatpush3.msra.mxu1 %v2124_v5 }
  0xdc   : > { %1607 = vmatprep.subr.mxu0 %v1966_v6  ;;  %1618 = vmatprep.subr.mxu1 %v1966_v6 }
  0xdd   : > { %1608 = vmatpush3.msra.mxu0 %v2132_v7  ;;  %1619 = vmatpush3.msra.mxu1 %v2134_v8 }
  0xde   : > { %1609 = vmatprep.subr.mxu0 %v1966_v6  ;;  %1620 = vmatprep.subr.mxu1 %v1966_v6 }
  0xdf   : > { %1610 = vmatpush3.msra.mxu0 %v2136_v11  ;;  %1621 = vmatpush3.msra.mxu1 %v2138_v12 }
  0xe0   : > { %1611 = vmatprep.subr.mxu0 %v1966_v6  ;;  %1622 = vmatprep.subr.mxu1 %v1966_v6 }
  0xe1   : > { %1612 = vmatpush3.msra.mxu0 %v2144_v13  ;;  %1613 = vmatprep.mubr.msk.f32.mxu0 %vm1969_vm1, %v1966_v6 }
  0xe2   : > { %1623 = vmatpush3.msra.mxu1 %v2146_v14  ;;  %1624 = vmatprep.mubr.msk.f32.mxu1 %vm1969_vm1, %v1966_v6 }
  0xe3   : > { %1614 = vmatmul.mubr.msk.f32.vlgmr.msra.gmra.mxu0 %vm316_vm2, %v612_v22  ;;  %1625 = vmatmul.mubr.msk.f32.vlgmr.msra.gmra.mxu1 %vm316_vm2, %v612_v22 }
  0xe4   : > { %1627 = vmatprep.subr.mxu0 %v1966_v6  ;;  %1638 = vmatprep.subr.mxu1 %v1966_v6 }
  0xe5   : > { %1628 = vmatpush3.msra.mxu0 %v2122_v4  ;;  %1639 = vmatpush3.msra.mxu1 %v2124_v5 }
  0xe6   : > { %1629 = vmatprep.subr.mxu0 %v1966_v6  ;;  %1640 = vmatprep.subr.mxu1 %v1966_v6 }
  0xe7   : > { %1630 = vmatpush3.msra.mxu0 %v2132_v7  ;;  %1641 = vmatpush3.msra.mxu1 %v2134_v8 }
  0xe8   : > { %1631 = vmatprep.subr.mxu0 %v1966_v6  ;;  %1642 = vmatprep.subr.mxu1 %v1966_v6 }
  0xe9   : > { %1632 = vmatpush3.msra.mxu0 %v2136_v11  ;;  %1643 = vmatpush3.msra.mxu1 %v2138_v12 }
  0xea   : > { %1633 = vmatprep.subr.mxu0 %v1966_v6  ;;  %1644 = vmatprep.subr.mxu1 %v1966_v6 }
  0xeb   : > { %1634 = vmatpush3.msra.mxu0 %v2144_v13  ;;  %1635 = vmatprep.mubr.msk.f32.mxu0 %vm1969_vm1, %v1966_v6 }
  0xec   : > { %1645 = vmatpush3.msra.mxu1 %v2146_v14  ;;  %1646 = vmatprep.mubr.msk.f32.mxu1 %vm1969_vm1, %v1966_v6 }
  0xed   : > { %1636 = vmatmul.mubr.msk.f32.vlgmr.msra.gmra.mxu0 %vm316_vm2, %v760_v24  ;;  %1647 = vmatmul.mubr.msk.f32.vlgmr.msra.gmra.mxu1 %vm316_vm2, %v760_v24 }
  0xee   : > { %1668 = vmatprep.subr.mxu1 %v1966_v6  ;;  %1676 = vmatprep.mubr.msk.f32.mxu1 %vm1969_vm1, %v1966_v6 }
  0xef   : > { %1669 = vmatpush3.msra.mxu1 %v2237_v25  ;;  %1649 = vmatprep.subr.mxu0 %v1966_v6 }
  0xf0   : > { %1670 = vmatprep.subr.mxu1 %v1966_v6  ;;  %1665 = vmatprep.mubr.msk.f32.mxu0 %vm1969_vm1, %v1966_v6 }
  0xf1   : > { %1671 = vmatpush3.msra.mxu1 %v2245_v26  ;;  %1650 = vmatpush3.msra.mxu0 %v919_v29 }
  0xf2   : > { %1672 = vmatprep.subr.mxu1 %v1966_v6  ;;  %1651 = vmatprep.subr.mxu0 %v1966_v6 }
  0xf3   : > { %1673 = vmatpush3.msra.mxu1 %v2255_v27  ;;  %1652 = vmatpush3.msra.mxu0 %v918_v30 }
  0xf4   : > { %1674 = vmatprep.subr.mxu1 %v1966_v6  ;;  %1653 = vmatprep.subr.mxu0 %v1966_v6 }
  0xf5   : > { %1675 = vmatpush3.msra.mxu1 %v2264_v28  ;;  %1654 = vmatpush3.msra.mxu0 %v917_v31 }
  0xf6   : > { %1679 = vmatprep.subr.mxu1 %v1966_v6  ;;  %1655 = vmatprep.subr.mxu0 %v1966_v6 }
  0xf7   : > { %1656 = vmatpush3.msra.mxu0 %v916_v32 }
  0xf8   : > { %1657 = vmatprep.subr.mxu0 %v1966_v6 }
  0xf9   : > { %1658 = vmatpush3.msra.mxu0 %v915_v33 }
  0xfa   : > { %1659 = vmatprep.subr.mxu0 %v1966_v6 }
  0xfb   : > { %1660 = vmatpush3.msra.mxu0 %v914_v34 }
  0xfc   : > { %1661 = vmatprep.subr.mxu0 %v1966_v6 }
  0xfd   : > { %1662 = vmatpush3.msra.mxu0 %v913_v35 }
  0xfe   : > { %1663 = vmatprep.subr.mxu0 %v1966_v6 }
  0xff   : > { %1664 = vmatpush3.msra.mxu0 %v912_v36 }
 0x100   : > { %1690 = vmatprep.subr.mxu0 %v1966_v6 }
 0x190   : > { %v386_v37 = vpop.f32.mrf.mxu0  ;;  %v2278_v38 = vpop.f32.mrf.mxu1 }
 0x191   : > { %1677 = vmatmul.mubr.msk.f32.vlgmr.msra.gmra.mxu1 %vm316_vm2, %v386_v37 }
 0x192   : > { %1680 = vmatpush3.msra.mxu1 %v2237_v25  ;;  %v1571_v39 = vpop.f32.mrf.mxu0  ;;  %v1582_v40 = vpop.f32.mrf.mxu1  ;;  %1687 = vmatprep.mubr.msk.f32.mxu1 %vm1969_vm1, %v1966_v6 }
 0x193   : > { %1681 = vmatprep.subr.mxu1 %v1966_v6 }
 0x194   : > { %1682 = vmatpush3.msra.mxu1 %v2245_v26 }
 0x195   : > { %1683 = vmatprep.subr.mxu1 %v1966_v6 }
 0x196   : > { %1684 = vmatpush3.msra.mxu1 %v2255_v27 }
 0x197   : > { %1685 = vmatprep.subr.mxu1 %v1966_v6 }
 0x198   : > { %1686 = vmatpush3.msra.mxu1 %v2264_v28 }
 0x199   : > { %v534_v41 = vpop.f32.mrf.mxu0  ;;  %v2290_v42 = vpop.f32.mrf.mxu1  ;;  %1701 = vmatprep.subr.mxu1 %v1966_v6 }
 0x19a   : > { %1688 = vmatmul.mubr.msk.f32.vlgmr.msra.gmra.mxu1 %vm316_vm2, %v534_v41  ;;  %v904_v49 = vadd.f32 %v534_v41, %v386_v37 }
 0x19b   : > { %v1593_v43 = vpop.f32.mrf.mxu0  ;;  %v1604_v44 = vpop.f32.mrf.mxu1  ;;  %1702 = vmatpush3.msra.mxu1 %v2237_v25  ;;  %1709 = vmatprep.mubr.msk.f32.mxu1 %vm1969_vm1, %v1966_v6 }
 0x19c   : > { %1703 = vmatprep.subr.mxu1 %v1966_v6 }
 0x19d   : > { %1704 = vmatpush3.msra.mxu1 %v2245_v26 }
 0x19e   : > { %1705 = vmatprep.subr.mxu1 %v1966_v6 }
 0x19f   : > { %1706 = vmatpush3.msra.mxu1 %v2255_v27 }
 0x1a0   : > { %1707 = vmatprep.subr.mxu1 %v1966_v6 }
 0x1a1   : > { %1708 = vmatpush3.msra.mxu1 %v2264_v28 }
 0x1a3   : > { %v682_v45 = vpop.f32.mrf.mxu0  ;;  %v2303_v46 = vpop.f32.mrf.mxu1 }
 0x1a4   : > { %v905_v50 = vadd.f32 %v904_v49, %v682_v45 }
 0x1a5   : > { %v1615_v47 = vpop.f32.mrf.mxu0  ;;  %v1626_v48 = vpop.f32.mrf.mxu1 }
 0x1ad   : > { %v830_v51 = vpop.f32.mrf.mxu0  ;;  %v2305_v52 = vpop.f32.mrf.mxu1 }
 0x1ae   : > { %v906_v53 = vadd.f32 %v905_v50, %v830_v51  ;;  %1710 = vmatmul.mubr.msk.f32.vlgmr.msra.gmra.mxu1 %vm316_vm2, %v830_v51 }
 0x1af   : > { %v1637_v54 = vpop.f32.mrf.mxu0  ;;  %v1648_v55 = vpop.f32.mrf.mxu1 }
 0x1b0   : > { %908 = vrot.lane.b32.xlu1 %v906_v53, %s1970_s17 }
 0x222   : > { %v909_v57 = vpop.permute.xlu1 %908 }
 0x223   : > { %v911_v58 = vsel %vm316_vm2, %v299_v56, %v909_v57 }
 0x224   : > { %1666 = vmatmul.mubr.msk.f32.vlgmr.msra.gmra.mxu0 %vm927_vm7, %v911_v58 }
 0x225   : > { %1691 = vmatpush3.msra.mxu0 %v2237_v25  ;;  %1698 = vmatprep.mubr.msk.f32.mxu0 %vm1969_vm1, %v1966_v6 }
 0x226   : > { %1692 = vmatprep.subr.mxu0 %v1966_v6 }
 0x227   : > { %1693 = vmatpush3.msra.mxu0 %v2245_v26 }
 0x228   : > { %1694 = vmatprep.subr.mxu0 %v1966_v6 }
 0x229   : > { %1695 = vmatpush3.msra.mxu0 %v2255_v27 }
 0x22a   : > { %1696 = vmatprep.subr.mxu0 %v1966_v6 }
 0x22b   : > { %1697 = vmatpush3.msra.mxu0 %v2264_v28 }
 0x22c   : > { %1699 = vmatmul.mubr.msk.f32.vlgmr.msra.gmra.mxu0 %vm316_vm2, %v682_v45 }
 0x251   : > { %v1083_v59 = vpop.f32.mrf.mxu1 }
 0x253   : > { %v1678_v60 = vpop.f32.mrf.mxu1 }
 0x25a   : > { %v1162_v61 = vpop.f32.mrf.mxu1 }
 0x25c   : > { %v1689_v62 = vpop.f32.mrf.mxu1 }
 0x26e   : > { %v1320_v63 = vpop.f32.mrf.mxu1 }
 0x270   : > { %v1711_v0 = vpop.f32.mrf.mxu1 }
 0x2e4   : > { %v997_v2 = vpop.f32.mrf.mxu0 }
 0x2e5   : > { %v998_v3 = vadd.f32 %v1479_v1, %v997_v2 }
 0x2e6   : > { %v1667_v4 = vpop.f32.mrf.mxu0 }
 0x2e7   : > { %1795 = vtanh.f32 %v998_v3  ;;  %1011 = vrot.lane.b32.xlu0 %v998_v3, %s1970_s17  ;;  %v1001_v8 = vmul.f32 0.5, %v998_v3 }
 0x2e9   : > { %1797 = vtanh.f32 %v1001_v8 }
 0x2ec   : > { %v1241_v5 = vpop.f32.mrf.mxu0 }
 0x2ee   : > { %v1700_v6 = vpop.f32.mrf.mxu0 }
 0x2f4   : > { %v1796_v7 = vpop.eup %1795 }
 0x2f5   : > { %1331 = vrot.lane.b32.xlu1 %v1796_v7, %s1971_s20 }
 0x2f6   : > { %v1798_v18 = vpop.eup %1797 }
 0x2f7   : > { %v1003_v33 = vmul.f32 0.5, %v1798_v18 }
 0x2f9   : > { %v1004_v39 = vadd.f32 0.5, %v1003_v33 }
 0x359   : > { %v1012_v9 = vpop.permute.xlu0 %1011 }
 0x35a   : > { %v1084_v10 = vadd.f32 %v1083_v59, %v1012_v9  ;;  %v1163_v11 = vadd.f32 %v1162_v61, %v1012_v9  ;;  %v1242_v12 = vadd.f32 %v1241_v5, %v1012_v9  ;;  %v1321_v13 = vadd.f32 %v1320_v63, %v1012_v9 }
 0x35c   : > { %v1087_v14 = vmul.f32 0.5, %v1084_v10  ;;  %v1166_v15 = vmul.f32 0.5, %v1163_v11  ;;  %v1245_v16 = vmul.f32 0.5, %v1242_v12  ;;  %v1324_v17 = vmul.f32 0.5, %v1321_v13 }
 0x35e   : > { %1799 = vtanh.f32 %v1087_v14 }
 0x35f   : > { %1801 = vtanh.f32 %v1166_v15 }
 0x360   : > { %1803 = vtanh.f32 %v1245_v16 }
 0x361   : > { %1805 = vtanh.f32 %v1324_v17 }
 0x367   : > { %v1332_v36 = vpop.permute.xlu1 %1331 }
 0x368   : > { %v1334_v43 = vmul.f32 %v1332_v36, %v1004_v39 }
 0x36b   : > { %v1800_v19 = vpop.eup %1799 }
 0x36c   : > { %v1802_v20 = vpop.eup %1801  ;;  %v1089_v21 = vmul.f32 0.5, %v1800_v19 }
 0x36d   : > { %v1804_v22 = vpop.eup %1803  ;;  %v1168_v23 = vmul.f32 0.5, %v1802_v20 }
 0x36e   : > { %v1806_v24 = vpop.eup %1805  ;;  %v1090_v25 = vadd.f32 0.5, %v1089_v21  ;;  %v1247_v26 = vmul.f32 0.5, %v1804_v22 }
 0x36f   : > { %v1169_v27 = vadd.f32 0.5, %v1168_v23  ;;  %v1326_v28 = vmul.f32 0.5, %v1806_v24 }
 0x370   : > { %v1091_v29 = vmul.f32 %v1090_v25, %v2278_v38  ;;  %v1248_v30 = vadd.f32 0.5, %v1247_v26 }
 0x371   : > { %v1170_v31 = vmul.f32 %v1169_v27, %v2290_v42  ;;  %v1327_v32 = vadd.f32 0.5, %v1326_v28 }
 0x372   : > { %v1249_v35 = vmul.f32 %v1248_v30, %v2303_v46 }
 0x373   : > { %v1171_v34 = vadd.f32 %v1170_v31, %v1091_v29  ;;  %v1328_v37 = vmul.f32 %v1327_v32, %v2305_v52 }
 0x375   : > { %v1250_v40 = vadd.f32 %v1249_v35, %v1171_v34 }
 0x377   : > { %v1329_v41 = vadd.f32 %v1328_v37, %v1250_v40 }
 0x379   : > { %v1335_v38 = vadd.f32 %v1334_v43, %v1329_v41 }
 0x37b   : > { %1807 = vtanh.f32 %v1335_v38  ;;  %1344 = vst.msk [vmem:[%s1343_s9] sm:$0xff] %vm316_vm2, %v1335_v38 }
 0x388   : > { %v1808_v42 = vpop.eup %1807 }
 0x389   : > { %1338 = vrot.lane.b32.xlu0 %v1808_v42, %s1970_s17 }
 0x38a   : > { %1876 = shalt.err (!%p1873_p2)
}
 0x38b   : > { %s1973_s30 = smov 128   ;;  %s1974_s8 = smov 8  }
 0x38c   : > { %1719 = dma.vmem_to_hbm [thread:$0]  (%p1737_p0), %s1358_s21, 512, %s2379_s5, [#allocation4], %s1973_s30, %s1973_s30, %s1974_s8  }
 0x38d   : > { %s1975_s10 = smov 96   ;;  %s1976_s11 = smov [#allocation8]  }
 0x38e   : > { %s1370_s12 = sshll.u32 %s1976_s11, 4  ;;  %s1349_s13 = scalar_lea.vmem [#allocation8], %s1485_s28  ;;  %s1371_s12 = int_to_ptr.vmem [resolvable:$true] %s1370_s12 }
 0x38f   : > { %s1887_s14 = scalar_lea.vmem %s1371_s12, 512  ;;  %p1894_p5 = scmp.lt.s32.totalorder %s1371_s12, %s1371_s12 }
 0x390   : > { %p1888_p3 = scmp.ne.s32.totalorder %s1371_s12, %s1887_s14  ;;  %p1895_p6 = scmp.lt.s32.totalorder %s1887_s14, %s1887_s14 }
 0x392   : > { %p1889_p4 = pnand %p1888_p3, %p1737_p0  ;;  %p1896_p8 = por %p1895_p6, %p1894_p5 }
 0x394   : > { %p1890_p1 = pneg %p1889_p4 }
 0x396   : > { %p1897_p7 = pnand %p1896_p8, %p1890_p1 }
 0x3fb   : > { %v1339_v44 = vpop.permute.xlu0 %1338 }
 0x3fc   : > { %v1341_v45 = vmul.f32 %v1339_v44, %v1004_v39 }
 0x3fe   : > { %1346 = vrot.lane.b32.xlu1 %v1341_v45, %s1975_s10 }
 0x470   : > { %v1347_v46 = vpop.permute.xlu1 %1346 }
 0x471   : > { %1350 = vst.msk [vmem:[%s1349_s13] sm:$0xff] %vm316_vm2, %v1347_v46 }
 0x472   : > { %1900 = shalt.err (!%p1897_p7)
}
 0x473   : > { %1721 = dma.vmem_to_hbm [thread:$0]  (%p1737_p0), %s1371_s12, 512, %s2380_s6, [#allocation9], %s1973_s30, %s1973_s30, %s1974_s8  }
 0x474   : > { %1936 = dma.done.wait (%p1737_p0), [#allocation4], 512  }
 0x475   : > { %1938 = vsyncadd (%p1737_p0), [#allocation4], 4294966784 }
 0x476   : > { %1940 = dma.done.wait (%p1737_p0), [#allocation9], 512  }
 0x477   : > { %1942 = vsyncadd (%p1737_p0), [#allocation9], 4294966784 }
 0x478 PF: > { %p20_p9 = scmp.ge.s32.totalorder %s2057_s7, 5   ;;  %s2393_s21 = smov %s1949_s22 }
 0x479   : > { %s2394_s22 = smov %s1953_s23  ;;  %s2395_s23 = smov %s2074_s15 }
 0x47a   : > { %s2396_s24 = smov %s2057_s7  ;;  %22 = sbr.rel (!%p20_p9) target bundleno = 6 (0x6), region = 98 }
 0x47f   :  { %1390 = vsyncpa [#allocation3], 1 }
 0x480   :  { %1392 = vsyncpa [#allocation3 + $0x1], 1 }
 0x481   :  { %1393 = vsyncpa [#allocation6], 1 }
 0x482   :  { %1394 = vsyncpa [#allocation4], 1 }
 0x483   :  { %1396 = vsyncpa [#allocation4 + $0x1], 1 }
 0x484   :  { %1397 = vsyncpa [#allocation9], 1 }

</bundles_post_ra>
